<compile_context>
chip_gen: v6e
topology: v6e:2x2x1
jax: 0.10.0
libtpu: 0.0.40
codegen_flags: <defaults>
</compile_context>

<pallas_src>
import jax
import jax.numpy as jnp
from jax.experimental import pallas as pl
from jax.experimental.pallas import tpu as pltpu

HIDDEN = 512


def _round_up(n, m):
    return ((n + m - 1) // m) * m


def mlp_head_kernel(x_ref, w1_ref, b1_ref, w2_ref, b2_ref, o_ref):
    # fc1: (tb, D_in) @ (D_in, 512), f32 accumulation on the MXU.
    h = jnp.dot(x_ref[...], w1_ref[...], preferred_element_type=jnp.float32)
    # Bias + ReLU in f32 on the VPU (idle slots while MXU/DMA dominate).
    h = jnp.maximum(h + b1_ref[...], 0.0)
    # fc2: cast activations back to the compute dtype for the MXU.
    out = jnp.dot(h.astype(w2_ref.dtype), w2_ref[...],
                  preferred_element_type=jnp.float32)
    o_ref[...] = (out + b2_ref[...]).astype(o_ref.dtype)


def mlp_head(x, w1, b1, w2, b2, *, tb=None, compute_dtype=jnp.bfloat16):
    """x: (B, D_in); w1: (D_in, 512); b1: (1, 512); w2: (512, D_out); b2: (1, D_out)."""
    B, d_in = x.shape
    d_out = w2.shape[1]
    out_dtype = x.dtype

    # ---- lane-dense output: pad the output feature dim to a multiple of 128.
    d_out_p = _round_up(max(d_out, 128), 128)
    if d_out_p != d_out:
        w2 = jnp.pad(w2, ((0, 0), (0, d_out_p - d_out)))
        b2 = jnp.pad(b2, ((0, 0), (0, d_out_p - d_out)))

    # ---- explicit batch tile: multiple of 8, capped at 512 rows.
    if tb is None:
        tb = min(512, _round_up(B, 8))
    tb = _round_up(tb, 8)
    B_p = _round_up(B, tb)
    if B_p != B:
        x = jnp.pad(x, ((0, B_p - B), (0, 0)))

    # ---- bf16 (or requested) matmul operands; biases stay f32.
    xc = x.astype(compute_dtype)
    w1c = w1.astype(compute_dtype)
    w2c = w2.astype(compute_dtype)
    b1f = b1.astype(jnp.float32)
    b2f = b2.astype(jnp.float32)

    grid = (B_p // tb,)
    cbytes = jnp.dtype(compute_dtype).itemsize
    obytes = jnp.dtype(out_dtype).itemsize

    # Cost estimate for XLA's scheduler around this small custom call.
    flops = 2 * B_p * (d_in * HIDDEN + HIDDEN * d_out_p)
    bytes_accessed = (B_p * d_in * cbytes
                      + d_in * HIDDEN * cbytes
                      + HIDDEN * d_out_p * cbytes
                      + (HIDDEN + d_out_p) * 4
                      + B_p * d_out_p * obytes)

    # VMEM budget: double-buffered x/out tiles + (double-buffered) resident
    # weights/biases + intermediate activations, with 2x headroom, clamped to
    # [32 MiB, 48 MiB] so it stays inside v7x's 64 MiB physical VMEM.
    est = (2 * tb * d_in * cbytes                      # x tile, double-buffered
           + 2 * tb * d_out_p * obytes                 # out tile, double-buffered
           + 2 * (d_in * HIDDEN + HIDDEN * d_out_p) * cbytes   # weights
           + 2 * (HIDDEN + d_out_p) * 4                # biases
           + tb * HIDDEN * 4 + tb * d_out_p * 4)       # f32 intermediates
    vmem_limit = int(min(max(2 * est, 32 << 20), 48 << 20))

    out_p = pl.pallas_call(
        mlp_head_kernel,
        out_shape=jax.ShapeDtypeStruct((B_p, d_out_p), out_dtype),
        grid_spec=pltpu.PrefetchScalarGridSpec(
            num_scalar_prefetch=0,
            grid=grid,
            in_specs=[
                pl.BlockSpec((tb, d_in), lambda i: (i, 0)),        # x tile
                pl.BlockSpec((d_in, HIDDEN), lambda i: (0, 0)),    # W1 (resident)
                pl.BlockSpec((1, HIDDEN), lambda i: (0, 0)),       # b1 (resident)
                pl.BlockSpec((HIDDEN, d_out_p), lambda i: (0, 0)), # W2 (resident)
                pl.BlockSpec((1, d_out_p), lambda i: (0, 0)),      # b2 (resident)
            ],
            out_specs=pl.BlockSpec((tb, d_out_p), lambda i: (i, 0)),
        ),
        compiler_params=pltpu.CompilerParams(
            dimension_semantics=("parallel",),
            vmem_limit_bytes=vmem_limit),
        cost_estimate=pl.CostEstimate(
            flops=flops, transcendentals=0, bytes_accessed=bytes_accessed),
    )(xc, w1c, b1f, w2c, b2f)

    # Strip batch / lane padding.
    return out_p[:B, :d_out]


def mlp_head_ref(x, w1, b1, w2, b2):
    h = jnp.maximum(x @ w1 + b1, 0.0)
    return h @ w2 + b2


if __name__ == "__main__":
    # Shapes consistent with the module: input_dim=32, output_dim=16,
    # hidden=512 (fixed by the module). Batch 512 with tb=128 exercises a
    # 4-step pipelined grid while staying tiny (x is 64 KiB).
    B, D_IN, D_OUT = 512, 32, 16
    TB = 128

    key = jax.random.PRNGKey(0)
    kx, kw1, kb1, kw2, kb2 = jax.random.split(key, 5)

    x = jax.random.normal(kx, (B, D_IN), dtype=jnp.float32)

    # Deterministic parameter init (uniform, roughly matching nn.Linear's scale).
    lim1 = 1.0 / jnp.sqrt(D_IN)
    w1 = jax.random.uniform(kw1, (D_IN, HIDDEN), minval=-lim1, maxval=lim1,
                            dtype=jnp.float32)
    b1 = jax.random.uniform(kb1, (1, HIDDEN), minval=-lim1, maxval=lim1,
                            dtype=jnp.float32)
    lim2 = 1.0 / jnp.sqrt(HIDDEN)
    w2 = jax.random.uniform(kw2, (HIDDEN, D_OUT), minval=-lim2, maxval=lim2,
                            dtype=jnp.float32)
    b2 = jax.random.uniform(kb2, (1, D_OUT), minval=-lim2, maxval=lim2,
                            dtype=jnp.float32)

    ref = mlp_head_ref(x, w1, b1, w2, b2)

    # f32 compute path: tight correctness check.
    out_f32 = jax.block_until_ready(
        mlp_head(x, w1, b1, w2, b2, tb=TB, compute_dtype=jnp.float32))
    assert out_f32.shape == (B, D_OUT), out_f32.shape
    assert jnp.allclose(out_f32, ref, atol=1e-4, rtol=1e-4), "f32 mismatch vs reference"

    # bf16 compute path (default, perf path): looser tolerance for bf16 operands.
    out_bf16 = jax.block_until_ready(mlp_head(x, w1, b1, w2, b2, tb=TB))
    assert out_bf16.shape == (B, D_OUT), out_bf16.shape
    assert jnp.allclose(out_bf16, ref, atol=2e-2, rtol=2e-2), "bf16 mismatch vs reference"

    print("KERNEL_OK")
</pallas_src>

<mosaic_0001>
module attributes {stable_mosaic.version = 11 : i64} {
  func.func @mlp_head_kernel(%arg0: i32, %arg1: memref<128x32xf32, #tpu.memory_space<vmem>>, %arg2: memref<32x512xf32, #tpu.memory_space<vmem>>, %arg3: memref<1x512xf32, #tpu.memory_space<vmem>>, %arg4: memref<512x128xf32, #tpu.memory_space<vmem>>, %arg5: memref<1x128xf32, #tpu.memory_space<vmem>>, %arg6: memref<128x128xf32, #tpu.memory_space<vmem>>) attributes {dimension_semantics = [#tpu.dimension_semantics<parallel>], iteration_bounds = array<i64: 4>, scalar_prefetch = 0 : i64, scratch_operands = 0 : i64, tpu.core_type = #tpu.core_type<tc>, window_params = [{transform_indices = @transform_0, window_bounds = array<i64: 128, 32>}, {pipeline_mode = #tpu.pipeline_mode<synchronous>, transform_indices = @transform_1, window_bounds = array<i64: 32, 512>}, {pipeline_mode = #tpu.pipeline_mode<synchronous>, transform_indices = @transform_2, window_bounds = array<i64: 1, 512>}, {pipeline_mode = #tpu.pipeline_mode<synchronous>, transform_indices = @transform_3, window_bounds = array<i64: 512, 128>}, {pipeline_mode = #tpu.pipeline_mode<synchronous>, transform_indices = @transform_4, window_bounds = array<i64: 1, 128>}, {transform_indices = @transform_5, window_bounds = array<i64: 128, 128>}]} {
    %c0 = arith.constant 0 : index
    %c0_0 = arith.constant 0 : index
    %0 = vector.load %arg1[%c0, %c0_0] : memref<128x32xf32, #tpu.memory_space<vmem>>, vector<128x32xf32>
    %c0_1 = arith.constant 0 : index
    %c0_2 = arith.constant 0 : index
    %1 = vector.load %arg2[%c0_1, %c0_2] : memref<32x512xf32, #tpu.memory_space<vmem>>, vector<32x512xf32>
    %cst = arith.constant dense<0.000000e+00> : vector<128x512xf32>
    %2 = tpu.matmul %0, %1, %cst {dimension_numbers = #tpu.dot_dimension_numbers<[1], [0], [0], [1], [0, 0, 1, 1], [], []>} : vector<128x32xf32>, vector<32x512xf32>, vector<128x512xf32> -> vector<128x512xf32>
    %c0_3 = arith.constant 0 : index
    %c0_4 = arith.constant 0 : index
    %3 = vector.load %arg3[%c0_3, %c0_4] : memref<1x512xf32, #tpu.memory_space<vmem>>, vector<1x512xf32>
    %4 = vector.broadcast %3 : vector<1x512xf32> to vector<128x512xf32>
    %5 = arith.addf %2, %4 : vector<128x512xf32>
    %cst_5 = arith.constant 0.000000e+00 : f32
    %6 = vector.broadcast %cst_5 : f32 to vector<128x512xf32>
    %7 = arith.maximumf %5, %6 : vector<128x512xf32>
    %c0_6 = arith.constant 0 : index
    %c0_7 = arith.constant 0 : index
    %8 = vector.load %arg4[%c0_6, %c0_7] : memref<512x128xf32, #tpu.memory_space<vmem>>, vector<512x128xf32>
    %cst_8 = arith.constant dense<0.000000e+00> : vector<128x128xf32>
    %9 = tpu.matmul %7, %8, %cst_8 {dimension_numbers = #tpu.dot_dimension_numbers<[1], [0], [0], [1], [0, 0, 1, 1], [], []>} : vector<128x512xf32>, vector<512x128xf32>, vector<128x128xf32> -> vector<128x128xf32>
    %c0_9 = arith.constant 0 : index
    %c0_10 = arith.constant 0 : index
    %10 = vector.load %arg5[%c0_9, %c0_10] : memref<1x128xf32, #tpu.memory_space<vmem>>, vector<1x128xf32>
    %11 = vector.broadcast %10 : vector<1x128xf32> to vector<128x128xf32>
    %12 = arith.addf %9, %11 : vector<128x128xf32>
    %c0_11 = arith.constant 0 : index
    %c0_12 = arith.constant 0 : index
    %13 = vector.load %arg6[%c0_11, %c0_12] : memref<128x128xf32, #tpu.memory_space<vmem>>, vector<128x128xf32>
    tpu.vector_store %arg6[%c0_11, %c0_12], %12 {strides = array<i32>} : memref<128x128xf32, #tpu.memory_space<vmem>>, vector<128x128xf32>,
    return
  }
  func.func @transform_0(%arg0: i32) -> (i32, i32) {
    %c0_i32 = arith.constant 0 : i32
    %c0_i32_0 = arith.constant 0 : i32
    return %arg0, %c0_i32 : i32, i32
  }
  func.func @transform_1(%arg0: i32) -> (i32, i32) {
    %c0_i32 = arith.constant 0 : i32
    %c0_i32_0 = arith.constant 0 : i32
    %c0_i32_1 = arith.constant 0 : i32
    return %c0_i32, %c0_i32_0 : i32, i32
  }
  func.func @transform_2(%arg0: i32) -> (i32, i32) {
    %c0_i32 = arith.constant 0 : i32
    %c0_i32_0 = arith.constant 0 : i32
    %c0_i32_1 = arith.constant 0 : i32
    return %c0_i32, %c0_i32_0 : i32, i32
  }
  func.func @transform_3(%arg0: i32) -> (i32, i32) {
    %c0_i32 = arith.constant 0 : i32
    %c0_i32_0 = arith.constant 0 : i32
    %c0_i32_1 = arith.constant 0 : i32
    return %c0_i32, %c0_i32_0 : i32, i32
  }
  func.func @transform_4(%arg0: i32) -> (i32, i32) {
    %c0_i32 = arith.constant 0 : i32
    %c0_i32_0 = arith.constant 0 : i32
    %c0_i32_1 = arith.constant 0 : i32
    return %c0_i32, %c0_i32_0 : i32, i32
  }
  func.func @transform_5(%arg0: i32) -> (i32, i32) {
    %c0_i32 = arith.constant 0 : i32
    %c0_i32_0 = arith.constant 0 : i32
    return %arg0, %c0_i32 : i32, i32
  }
}

</mosaic_0001>

<bundles_post_ra>
// kernel: tpu_custom_call.1
= control target key start
LH: loop header
LB: loop body
LE: loop exit
PB: predicated region body
PF: predicated region fallthrough
CT: control target
= control target key end

     0   :  { %10 = vsyncpa [#allocation3], 0  ;;  %s2054_s0 = inlined_call_operand.vmem [shape: f32[512,32], index: 0, kind: input, shape index: {}]   ;;  %s2055_s1 = inlined_call_operand.vmem [shape: f32[32,512], index: 1, kind: input, shape index: {}]   ;;  %s2056_s2 = inlined_call_operand.vmem [shape: f32[1,512], index: 2, kind: input, shape index: {}]   ;;  %s2057_s3 = inlined_call_operand.vmem [shape: f32[512,128], index: 3, kind: input, shape index: {}]   ;;  %s2058_s4 = inlined_call_operand.vmem [shape: f32[1,128], index: 4, kind: input, shape index: {}]   ;;  %s2059_s5 = inlined_call_operand.hbm [shape: f32[512,128], index: 5, kind: output, shape index: {}]  }
   0x1   :  { %12 = vsyncpa [#allocation3 + $0x1], 0  ;;  %s1512_s18 = smov 0   ;;  %s1514_s19 = smov 0  }
   0x2   :  { %s1516_s20 = smov 0   ;;  %s1518_s21 = smov 0  }
   0x3 LB: > { %s1533_s22 = sadd.s32 4294967295, %s1476_s21   ;;  %s1168_s23 = sadd.s32 4294967294, %s1476_s21   ;;  %s1476_s21 = sphi %s1518_s21, %s2065_s21   ;;  %s1472_s20 = sphi %s1516_s20, %s2064_s20   ;;  %s1468_s19 = sphi %s1514_s19, %s2063_s19   ;;  %s1464_s18 = sphi %s1512_s18, %s2062_s18  }
   0x4   : > { %s1537_s24 = sadd.s32 1, %s1476_s21   ;;  %s135_s25 = sadd.s32 1, %s1472_s20 }
   0x5   : > { %s132_s26 = ssub.s32 %s1476_s21, %s1537_s24  ;;  %p145_p0 = scmp.ne.s32.totalorder %s1472_s20, %s1468_s19 }
   0x6   : > { %p133_p1 = scmp.eq.s32.totalorder %s132_s26, 0  ;;  %p146_p2 = scmp.eq.s32.totalorder %s1533_s22, 3 }
   0x7   : > { %p151_p3 = scmp.ne.s32.totalorder %s1468_s19, %s1464_s18  ;;  %p152_p4 = scmp.eq.s32.totalorder %s1168_s23, 3 }
   0x8   : > { %s1548_s27 = scalar_select %p133_p1, %s1472_s20, %s135_s25  }
   0x9   : > { %p1550_p5 = por %p146_p2, %p145_p0  ;;  %p1554_p6 = por %p152_p4, %p151_p3 }
   0xa   : > { %p1171_p7 = scmp.ge.s32.totalorder %s1476_s21, 1  ;;  %p191_p8 = scmp.lt.s32.totalorder %s1476_s21, 5 }
   0xc   : > { %p192_p9 = pnand %p1171_p7, %p191_p8 }
   0xd   : > { %s1173_s11 = sshll.u32 (!%p192_p9), %s1533_s22, 4  ;;  %s216_s26 = sand.u32 (!%p192_p9), 1, %s1468_s19  }
   0xe   : > { %195 = sbr.rel (%p192_p9) target bundleno = 504 (0x1f8), region = 40  ;;  %p220_p10 = scmp.lt.s32.totalorder (!%p192_p9), %s1173_s11, 63 }
   0xf   : > { %s1172_s7 = sshll.u32 (!%p192_p9), %s216_s26, 7  ;;  %s1213_s9 = sshll.u32 (!%p192_p9), %s1533_s22, 11 }
  0x10   : > { %s1970_s8 = scalar_lea.vmem (!%p192_p9), [#allocation2], %s1172_s7  ;;  %s2007_s13 = scalar_lea.hbm (!%p192_p9), %s2059_s5, %s1213_s9 }
  0x11   : > { %s2014_s14 = scalar_lea.sflag (!%p192_p9), [#allocation3], %s216_s26  ;;  %s1479_s15 = smov (!%p192_p9), [#allocation2]  }
  0x12   : > { %s1420_s16 = sshll.u32 (!%p192_p9), %s1479_s15, 4  ;;  %s1421_s16 = int_to_ptr.vmem [resolvable:$false] %s1420_s16 }
  0x13   : > { %v255_v0 = vld [vmem:[%s2055_s1 + $0x68] sm:$0xff]  ;;  %v257_v1 = vld [vmem:[%s2055_s1 + $0x78] sm:$0xff]  ;;  %v254_v2 = vld [vmem:[%s2055_s1 + $0x60] sm:$0xff]  ;;  %s2067_s11 = smov (!%p220_p10, %s1173_s11), 63  ;;  %vm280_vm0 = vcmask 261120   ;;  %v1478_v17 = vmov 0.0  }
  0x14   : > { %353 = vmatprep.subr.mxu0 %v255_v0  ;;  %514 = vmatprep.subr.mxu1 %v257_v1  ;;  %v256_v3 = vld [vmem:[%s2055_s1 + $0x70] sm:$0xff]  ;;  %v251_v4 = vld [vmem:[%s2055_s1 + $0x48] sm:$0xff]  ;;  %v253_v5 = vld [vmem:[%s2055_s1 + $0x58] sm:$0xff]  ;;  %s1174_s30 = sshll.u32 %s2067_s11, 3  ;;  %s1422_s17 = scalar_lea.vmem %s1421_s16, 4096 }
  0x15   : > { %354 = vmatpush1.msra.mxu0 %v254_v2  ;;  %515 = vmatpush1.msra.mxu1 %v256_v3  ;;  %v250_v6 = vld [vmem:[%s2055_s1 + $0x40] sm:$0xff]  ;;  %v252_v7 = vld [vmem:[%s2055_s1 + $0x50] sm:$0xff]  ;;  %v247_v8 = vld [vmem:[%s2055_s1 + $0x28] sm:$0xff]  ;;  %s1612_s10 = scalar_lea.vmem %s2054_s0, %s1174_s30 }
  0x16   : > { %355 = vmatprep.subr.mxu0 %v251_v4  ;;  %516 = vmatprep.subr.mxu1 %v253_v5  ;;  %v249_v9 = vld [vmem:[%s2055_s1 + $0x38] sm:$0xff]  ;;  %v246_v10 = vld [vmem:[%s2055_s1 + $0x20] sm:$0xff]  ;;  %v248_v11 = vld [vmem:[%s2055_s1 + $0x30] sm:$0xff] }
  0x17   : > { %356 = vmatpush1.msra.mxu0 %v250_v6  ;;  %517 = vmatpush1.msra.mxu1 %v252_v7  ;;  %v243_v12 = vld [vmem:[%s2055_s1 + $0x8] sm:$0xff]  ;;  %v245_v13 = vld [vmem:[%s2055_s1 + $0x18] sm:$0xff]  ;;  %v242_v14 = vld [vmem:[%s2055_s1] sm:$0xff] }
  0x18   : > { %357 = vmatprep.subr.mxu0 %v247_v8  ;;  %518 = vmatprep.subr.mxu1 %v249_v9  ;;  %v244_v15 = vld [vmem:[%s2055_s1 + $0x10] sm:$0xff]  ;;  %v226_v16 = vld [vmem:[%s1612_s10] sm:$0xff]  ;;  %v746_v18 = vld [vmem:[%s2057_s3 + $0xf8] sm:$0xff] }
  0x19   : > { %358 = vmatpush1.msra.mxu0 %v246_v10  ;;  %519 = vmatpush1.msra.mxu1 %v248_v11  ;;  %v778_v19 = vld [vmem:[%s2057_s3 + $0x1f8] sm:$0xff]  ;;  %v227_v22 = vld [vmem:[%s1612_s10 + $0x8] sm:$0xff]  ;;  %v745_v23 = vld [vmem:[%s2057_s3 + $0xf0] sm:$0xff] }
  0x1a   : > { %359 = vmatprep.subr.mxu0 %v243_v12  ;;  %520 = vmatprep.subr.mxu1 %v245_v13  ;;  %v730_v20 = vld [vmem:[%s2057_s3 + $0x78] sm:$0xff]  ;;  %v777_v24 = vld [vmem:[%s2057_s3 + $0x1f0] sm:$0xff]  ;;  %v744_v28 = vld [vmem:[%s2057_s3 + $0xe8] sm:$0xff] }
  0x1b   : > { %360 = vmatpush1.msra.mxu0 %v242_v14  ;;  %393 = vmatprep.mubr.f32.mxu0 %v1478_v17  ;;  %v762_v21 = vld [vmem:[%s2057_s3 + $0x178] sm:$0xff]  ;;  %v729_v25 = vld [vmem:[%s2057_s3 + $0x70] sm:$0xff]  ;;  %v776_v29 = vld [vmem:[%s2057_s3 + $0x1e8] sm:$0xff] }
  0x1c   : > { %521 = vmatpush1.msra.mxu1 %v244_v15  ;;  %554 = vmatprep.mubr.f32.mxu1 %v1478_v17  ;;  %v761_v26 = vld [vmem:[%s2057_s3 + $0x170] sm:$0xff]  ;;  %v728_v30 = vld [vmem:[%s2057_s3 + $0x68] sm:$0xff]  ;;  %v229_v32 = vld [vmem:[%s1612_s10 + $0x18] sm:$0xff] }
  0x1d   : > { %1175 = vmatmul.mubr.msk.f32.vlgmr.msra.gmra.mxu0 %vm280_vm0, %v226_v16  ;;  %1191 = vmatmul.mubr.msk.f32.vlgmr.msra.gmra.mxu1 %vm280_vm0, %v226_v16  ;;  %v228_v27 = vld [vmem:[%s1612_s10 + $0x10] sm:$0xff]  ;;  %v760_v31 = vld [vmem:[%s2057_s3 + $0x168] sm:$0xff]  ;;  %v743_v33 = vld [vmem:[%s2057_s3 + $0xe0] sm:$0xff] }
  0x1e   : > { %399 = vmatprep.mubr.f32.mxu0 %v1478_v17  ;;  %560 = vmatprep.mubr.f32.mxu1 %v1478_v17  ;;  %v775_v34 = vld [vmem:[%s2057_s3 + $0x1e0] sm:$0xff]  ;;  %v742_v38 = vld [vmem:[%s2057_s3 + $0xd8] sm:$0xff]  ;;  %v231_v42 = vld [vmem:[%s1612_s10 + $0x28] sm:$0xff] }
  0x1f   : > { %1214 = vmatprep.subr.mxu0 %v746_v18  ;;  %1294 = vmatprep.subr.mxu1 %v778_v19  ;;  %v727_v35 = vld [vmem:[%s2057_s3 + $0x60] sm:$0xff]  ;;  %v774_v39 = vld [vmem:[%s2057_s3 + $0x1d8] sm:$0xff]  ;;  %v741_v43 = vld [vmem:[%s2057_s3 + $0xd0] sm:$0xff] }
  0x20   : > { %1215 = vmatpush3.msra.mxu0 %v730_v20  ;;  %1295 = vmatpush3.msra.mxu1 %v762_v21  ;;  %v759_v36 = vld [vmem:[%s2057_s3 + $0x160] sm:$0xff]  ;;  %v726_v40 = vld [vmem:[%s2057_s3 + $0x58] sm:$0xff]  ;;  %v773_v44 = vld [vmem:[%s2057_s3 + $0x1d0] sm:$0xff] }
  0x21   : > { %1176 = vmatmul.mubr.msk.f32.gmra.mxu0 %vm280_vm0, %v227_v22  ;;  %1192 = vmatmul.mubr.msk.f32.gmra.mxu1 %vm280_vm0, %v227_v22  ;;  %v230_v37 = vld [vmem:[%s1612_s10 + $0x20] sm:$0xff]  ;;  %v758_v41 = vld [vmem:[%s2057_s3 + $0x158] sm:$0xff]  ;;  %v725_v45 = vld [vmem:[%s2057_s3 + $0x50] sm:$0xff] }
  0x22   : > { %405 = vmatprep.mubr.f32.mxu0 %v1478_v17  ;;  %566 = vmatprep.mubr.f32.mxu1 %v1478_v17  ;;  %v757_v46 = vld [vmem:[%s2057_s3 + $0x150] sm:$0xff]  ;;  %v740_v48 = vld [vmem:[%s2057_s3 + $0xc8] sm:$0xff]  ;;  %v233_v52 = vld [vmem:[%s1612_s10 + $0x38] sm:$0xff] }
  0x23   : > { %1216 = vmatprep.subr.mxu0 %v745_v23  ;;  %1296 = vmatprep.subr.mxu1 %v777_v24  ;;  %v232_v47 = vld [vmem:[%s1612_s10 + $0x30] sm:$0xff]  ;;  %v772_v49 = vld [vmem:[%s2057_s3 + $0x1c8] sm:$0xff]  ;;  %v739_v53 = vld [vmem:[%s2057_s3 + $0xc0] sm:$0xff] }
  0x24   : > { %1217 = vmatpush3.msra.mxu0 %v729_v25  ;;  %1297 = vmatpush3.msra.mxu1 %v761_v26  ;;  %v724_v50 = vld [vmem:[%s2057_s3 + $0x48] sm:$0xff]  ;;  %v771_v54 = vld [vmem:[%s2057_s3 + $0x1c0] sm:$0xff]  ;;  %v738_v58 = vld [vmem:[%s2057_s3 + $0xb8] sm:$0xff] }
  0x25   : > { %1177 = vmatmul.mubr.msk.f32.gmra.mxu0 %vm280_vm0, %v228_v27  ;;  %1193 = vmatmul.mubr.msk.f32.gmra.mxu1 %vm280_vm0, %v228_v27  ;;  %v756_v51 = vld [vmem:[%s2057_s3 + $0x148] sm:$0xff]  ;;  %v723_v55 = vld [vmem:[%s2057_s3 + $0x40] sm:$0xff]  ;;  %v770_v59 = vld [vmem:[%s2057_s3 + $0x1b8] sm:$0xff] }
  0x26   : > { %411 = vmatprep.mubr.f32.mxu0 %v1478_v17  ;;  %572 = vmatprep.mubr.f32.mxu1 %v1478_v17  ;;  %v755_v56 = vld [vmem:[%s2057_s3 + $0x140] sm:$0xff]  ;;  %v722_v60 = vld [vmem:[%s2057_s3 + $0x38] sm:$0xff]  ;;  %v235_v62 = vld [vmem:[%s1612_s10 + $0x48] sm:$0xff] }
  0x27   : > { %1218 = vmatprep.subr.mxu0 %v744_v28  ;;  %1298 = vmatprep.subr.mxu1 %v776_v29  ;;  %v234_v57 = vld [vmem:[%s1612_s10 + $0x40] sm:$0xff]  ;;  %v754_v61 = vld [vmem:[%s2057_s3 + $0x138] sm:$0xff]  ;;  %v737_v63 = vld [vmem:[%s2057_s3 + $0xb0] sm:$0xff] }
  0x28   : > { %1219 = vmatpush3.msra.mxu0 %v728_v30  ;;  %1299 = vmatpush3.msra.mxu1 %v760_v31  ;;  %v769_v0 = vld [vmem:[%s2057_s3 + $0x1b0] sm:$0xff]  ;;  %v736_v4 = vld [vmem:[%s2057_s3 + $0xa8] sm:$0xff]  ;;  %v237_v8 = vld [vmem:[%s1612_s10 + $0x58] sm:$0xff] }
  0x29   : > { %1178 = vmatmul.mubr.msk.f32.gmra.mxu0 %vm280_vm0, %v229_v32  ;;  %1194 = vmatmul.mubr.msk.f32.gmra.mxu1 %vm280_vm0, %v229_v32  ;;  %v721_v1 = vld [vmem:[%s2057_s3 + $0x30] sm:$0xff]  ;;  %v768_v5 = vld [vmem:[%s2057_s3 + $0x1a8] sm:$0xff]  ;;  %v735_v9 = vld [vmem:[%s2057_s3 + $0xa0] sm:$0xff] }
  0x2a   : > { %417 = vmatprep.mubr.f32.mxu0 %v1478_v17  ;;  %578 = vmatprep.mubr.f32.mxu1 %v1478_v17  ;;  %v753_v2 = vld [vmem:[%s2057_s3 + $0x130] sm:$0xff]  ;;  %v720_v6 = vld [vmem:[%s2057_s3 + $0x28] sm:$0xff]  ;;  %v767_v10 = vld [vmem:[%s2057_s3 + $0x1a0] sm:$0xff] }
  0x2b   : > { %1220 = vmatprep.subr.mxu0 %v743_v33  ;;  %1300 = vmatprep.subr.mxu1 %v775_v34  ;;  %v236_v3 = vld [vmem:[%s1612_s10 + $0x50] sm:$0xff]  ;;  %v752_v7 = vld [vmem:[%s2057_s3 + $0x128] sm:$0xff]  ;;  %v719_v11 = vld [vmem:[%s2057_s3 + $0x20] sm:$0xff]  ;;  %v260_v33 = vlaneseq }
  0x2c   : > { %1221 = vmatpush3.msra.mxu0 %v727_v35  ;;  %1301 = vmatpush3.msra.mxu1 %v759_v36  ;;  %v751_v12 = vld [vmem:[%s2057_s3 + $0x120] sm:$0xff]  ;;  %v734_v14 = vld [vmem:[%s2057_s3 + $0x98] sm:$0xff]  ;;  %v239_v19 = vld [vmem:[%s1612_s10 + $0x68] sm:$0xff] }
  0x2d   : > { %1179 = vmatmul.mubr.msk.f32.gmra.mxu0 %vm280_vm0, %v230_v37  ;;  %1195 = vmatmul.mubr.msk.f32.gmra.mxu1 %vm280_vm0, %v230_v37  ;;  %v238_v13 = vld [vmem:[%s1612_s10 + $0x60] sm:$0xff]  ;;  %v766_v15 = vld [vmem:[%s2057_s3 + $0x198] sm:$0xff]  ;;  %v733_v20 = vld [vmem:[%s2057_s3 + $0x90] sm:$0xff]  ;;  %v261_v34 = vshrl.u32 %v260_v33, 7 }
  0x2e   : > { %423 = vmatprep.mubr.f32.mxu0 %v1478_v17  ;;  %584 = vmatprep.mubr.f32.mxu1 %v1478_v17  ;;  %v718_v16 = vld [vmem:[%s2057_s3 + $0x18] sm:$0xff]  ;;  %v765_v21 = vld [vmem:[%s2057_s3 + $0x190] sm:$0xff]  ;;  %v732_v25 = vld [vmem:[%s2057_s3 + $0x88] sm:$0xff] }
  0x2f   : > { %1222 = vmatprep.subr.mxu0 %v742_v38  ;;  %1302 = vmatprep.subr.mxu1 %v774_v39  ;;  %v750_v18 = vld [vmem:[%s2057_s3 + $0x118] sm:$0xff]  ;;  %v717_v22 = vld [vmem:[%s2057_s3 + $0x10] sm:$0xff]  ;;  %v716_v27 = vld [vmem:[%s2057_s3 + $0x8] sm:$0xff]  ;;  %v270_v35 = vsub.s32 2, %v261_v34  ;;  %v262_v36 = vsub.s32 0, %v261_v34  ;;  %v266_v38 = vsub.s32 1, %v261_v34 }
  0x30   : > { %1223 = vmatpush3.msra.mxu0 %v726_v40  ;;  %1303 = vmatpush3.msra.mxu1 %v758_v41  ;;  %v749_v23 = vld [vmem:[%s2057_s3 + $0x110] sm:$0xff]  ;;  %v241_v26 = vld [vmem:[%s1612_s10 + $0x78] sm:$0xff]  ;;  %v764_v28 = vld [vmem:[%s2057_s3 + $0x188] sm:$0xff]  ;;  %v274_v39 = vsub.s32 3, %v261_v34 }
  0x31   : > { %1180 = vmatmul.mubr.msk.f32.gmra.mxu0 %vm280_vm0, %v231_v42  ;;  %1196 = vmatmul.mubr.msk.f32.gmra.mxu1 %vm280_vm0, %v231_v42  ;;  %v240_v24 = vld [vmem:[%s1612_s10 + $0x70] sm:$0xff]  ;;  %v731_v29 = vld [vmem:[%s2057_s3 + $0x80] sm:$0xff]  ;;  %s1106_s10 = sshll.u32 %s1970_s8, 4  ;;  %s2009_s10 = int_to_ptr.vmem [resolvable:$true] %s1106_s10 }
  0x32   : > { %429 = vmatprep.mubr.f32.mxu0 %v1478_v17  ;;  %590 = vmatprep.mubr.f32.mxu1 %v1478_v17  ;;  %v763_v30 = vld [vmem:[%s2057_s3 + $0x180] sm:$0xff]  ;;  %s1416_s22 = scalar_lea.vmem %s2009_s10, 2048  ;;  %p1423_p0 = scmp.lt.s32.totalorder %s2009_s10, %s1421_s16 }
  0x33   : > { %1224 = vmatprep.subr.mxu0 %v741_v43  ;;  %1304 = vmatprep.subr.mxu1 %v773_v44  ;;  %v715_v31 = vld [vmem:[%s2057_s3] sm:$0xff]  ;;  %p1417_p11 = scmp.ne.s32.totalorder %s2009_s10, %s1416_s22  ;;  %p1424_p1 = scmp.lt.s32.totalorder %s1422_s17, %s1416_s22 }
  0x34   : > { %1225 = vmatpush3.msra.mxu0 %v725_v45  ;;  %1305 = vmatpush3.msra.mxu1 %v757_v46  ;;  %v747_v32 = vld [vmem:[%s2057_s3 + $0x100] sm:$0xff] }
  0x35   : > { %1181 = vmatmul.mubr.msk.f32.gmra.mxu0 %vm280_vm0, %v232_v47  ;;  %1197 = vmatmul.mubr.msk.f32.gmra.mxu1 %vm280_vm0, %v232_v47  ;;  %v258_v37 = vld [vmem:[%s2056_s2] sm:$0xf]  ;;  %p1418_p12 = pnand %p1417_p11, %p1550_p5  ;;  %p1425_p2 = por %p1424_p1, %p1423_p0 }
  0x36   : > { %435 = vmatprep.mubr.f32.mxu0 %v1478_v17  ;;  %596 = vmatprep.mubr.f32.mxu1 %v1478_v17  ;;  %v1889_v40 = vrot.slane %v258_v37, %v270_v35  ;;  %v1891_v41 = vrot.slane %v258_v37, %v262_v36  ;;  %v1893_v42 = vrot.slane %v258_v37, %v266_v38 }
  0x37   : > { %1226 = vmatprep.subr.mxu0 %v740_v48  ;;  %1306 = vmatprep.subr.mxu1 %v772_v49  ;;  %v1895_v43 = vrot.slane %v258_v37, %v274_v39  ;;  %p1419_p13 = pneg %p1418_p12 }
  0x38   : > { %1227 = vmatpush3.msra.mxu0 %v724_v50  ;;  %1307 = vmatpush3.msra.mxu1 %v756_v51 }
  0x39   : > { %1182 = vmatmul.mubr.msk.f32.gmra.mxu0 %vm280_vm0, %v233_v52  ;;  %1198 = vmatmul.mubr.msk.f32.gmra.mxu1 %vm280_vm0, %v233_v52  ;;  %p1426_p3 = pnand %p1425_p2, %p1419_p13 }
  0x3a   : > { %441 = vmatprep.mubr.f32.mxu0 %v1478_v17  ;;  %602 = vmatprep.mubr.f32.mxu1 %v1478_v17 }
  0x3b   : > { %1228 = vmatprep.subr.mxu0 %v739_v53  ;;  %1308 = vmatprep.subr.mxu1 %v771_v54 }
  0x3c   : > { %1229 = vmatpush3.msra.mxu0 %v723_v55  ;;  %1309 = vmatpush3.msra.mxu1 %v755_v56 }
  0x3d   : > { %1183 = vmatmul.mubr.msk.f32.gmra.mxu0 %vm280_vm0, %v234_v57  ;;  %1199 = vmatmul.mubr.msk.f32.gmra.mxu1 %vm280_vm0, %v234_v57 }
  0x3e   : > { %447 = vmatprep.mubr.f32.mxu0 %v1478_v17  ;;  %608 = vmatprep.mubr.f32.mxu1 %v1478_v17 }
  0x3f   : > { %1230 = vmatprep.subr.mxu0 %v738_v58  ;;  %1310 = vmatprep.subr.mxu1 %v770_v59 }
  0x40   : > { %1231 = vmatpush3.msra.mxu0 %v722_v60  ;;  %1311 = vmatpush3.msra.mxu1 %v754_v61 }
  0x41   : > { %1184 = vmatmul.mubr.msk.f32.gmra.mxu0 %vm280_vm0, %v235_v62  ;;  %1200 = vmatmul.mubr.msk.f32.gmra.mxu1 %vm280_vm0, %v235_v62 }
  0x42   : > { %453 = vmatprep.mubr.f32.mxu0 %v1478_v17  ;;  %614 = vmatprep.mubr.f32.mxu1 %v1478_v17 }
  0x43   : > { %1232 = vmatprep.subr.mxu0 %v737_v63  ;;  %1312 = vmatprep.subr.mxu1 %v769_v0 }
  0x44   : > { %1233 = vmatpush3.msra.mxu0 %v721_v1  ;;  %1313 = vmatpush3.msra.mxu1 %v753_v2 }
  0x45   : > { %1185 = vmatmul.mubr.msk.f32.gmra.mxu0 %vm280_vm0, %v236_v3  ;;  %1201 = vmatmul.mubr.msk.f32.gmra.mxu1 %vm280_vm0, %v236_v3 }
  0x46   : > { %459 = vmatprep.mubr.f32.mxu0 %v1478_v17  ;;  %620 = vmatprep.mubr.f32.mxu1 %v1478_v17 }
  0x47   : > { %1234 = vmatprep.subr.mxu0 %v736_v4  ;;  %1314 = vmatprep.subr.mxu1 %v768_v5 }
  0x48   : > { %1235 = vmatpush3.msra.mxu0 %v720_v6  ;;  %1315 = vmatpush3.msra.mxu1 %v752_v7 }
  0x49   : > { %1186 = vmatmul.mubr.msk.f32.gmra.mxu0 %vm280_vm0, %v237_v8  ;;  %1202 = vmatmul.mubr.msk.f32.gmra.mxu1 %vm280_vm0, %v237_v8 }
  0x4a   : > { %465 = vmatprep.mubr.f32.mxu0 %v1478_v17  ;;  %626 = vmatprep.mubr.f32.mxu1 %v1478_v17 }
  0x4b   : > { %1236 = vmatprep.subr.mxu0 %v735_v9  ;;  %1316 = vmatprep.subr.mxu1 %v767_v10 }
  0x4c   : > { %1237 = vmatpush3.msra.mxu0 %v719_v11  ;;  %1317 = vmatpush3.msra.mxu1 %v751_v12 }
  0x4d   : > { %1187 = vmatmul.mubr.msk.f32.gmra.mxu0 %vm280_vm0, %v238_v13  ;;  %1203 = vmatmul.mubr.msk.f32.gmra.mxu1 %vm280_vm0, %v238_v13 }
  0x4e   : > { %471 = vmatprep.mubr.f32.mxu0 %v1478_v17  ;;  %632 = vmatprep.mubr.f32.mxu1 %v1478_v17 }
  0x4f   : > { %1238 = vmatprep.subr.mxu0 %v734_v14  ;;  %1318 = vmatprep.subr.mxu1 %v766_v15 }
  0x50   : > { %1239 = vmatpush3.msra.mxu0 %v718_v16  ;;  %1319 = vmatpush3.msra.mxu1 %v750_v18 }
  0x51   : > { %1188 = vmatmul.mubr.msk.f32.gmra.mxu0 %vm280_vm0, %v239_v19  ;;  %1204 = vmatmul.mubr.msk.f32.gmra.mxu1 %vm280_vm0, %v239_v19 }
  0x52   : > { %477 = vmatprep.mubr.f32.mxu0 %v1478_v17  ;;  %638 = vmatprep.mubr.f32.mxu1 %v1478_v17 }
  0x53   : > { %1240 = vmatprep.subr.mxu0 %v733_v20  ;;  %1320 = vmatprep.subr.mxu1 %v765_v21 }
  0x54   : > { %1241 = vmatpush3.msra.mxu0 %v717_v22  ;;  %1321 = vmatpush3.msra.mxu1 %v749_v23 }
  0x55   : > { %1189 = vmatmul.mubr.msk.f32.gmra.mxu0 %vm280_vm0, %v240_v24  ;;  %1205 = vmatmul.mubr.msk.f32.gmra.mxu1 %vm280_vm0, %v240_v24 }
  0x56   : > { %483 = vmatprep.mubr.f32.mxu0 %v1478_v17  ;;  %644 = vmatprep.mubr.f32.mxu1 %v1478_v17  ;;  %v748_v17 = vld [vmem:[%s2057_s3 + $0x108] sm:$0xff] }
  0x57   : > { %1242 = vmatprep.subr.mxu0 %v732_v25  ;;  %1322 = vmatprep.subr.mxu1 %v764_v28 }
  0x58   : > { %1243 = vmatpush3.msra.mxu0 %v716_v27  ;;  %1323 = vmatpush3.msra.mxu1 %v748_v17 }
  0x59   : > { %1190 = vmatmul.mubr.msk.f32.gmra.mxu0 %vm280_vm0, %v241_v26  ;;  %1206 = vmatmul.mubr.msk.f32.gmra.mxu1 %vm280_vm0, %v241_v26 }
  0x5a   : > { %1244 = vmatprep.subr.mxu0 %v731_v29  ;;  %1324 = vmatprep.subr.mxu1 %v763_v30 }
  0x5b   : > { %1245 = vmatpush3.msra.mxu0 %v715_v31  ;;  %1325 = vmatpush3.msra.mxu1 %v747_v32 }
  0xdd   : > { %v395_v44 = vpop.f32.mrf.mxu0  ;;  %v556_v45 = vpop.f32.mrf.mxu1 }
  0xde   : > { %v557_v46 = vadd.f32 %v556_v45, %v1889_v40  ;;  %v396_v47 = vadd.f32 %v395_v44, %v1891_v41 }
  0xdf   : > { %v397_v48 = vpop.f32.mrf.mxu0  ;;  %v558_v49 = vpop.f32.mrf.mxu1 }
  0xe0   : > { %v398_v50 = vadd.f32 %v397_v48, %v1893_v42  ;;  %v559_v51 = vadd.f32 %v558_v49, %v1895_v43  ;;  %v653_v52 = vmax.f32 %v557_v46, 0.0  ;;  %v651_v58 = vmax.f32 %v396_v47, 0.0 }
  0xe1   : > { %v401_v53 = vpop.f32.mrf.mxu0  ;;  %v562_v54 = vpop.f32.mrf.mxu1 }
  0xe2   : > { %v652_v55 = vmax.f32 %v398_v50, 0.0  ;;  %v654_v56 = vmax.f32 %v559_v51, 0.0  ;;  %v563_v57 = vadd.f32 %v562_v54, %v1889_v40  ;;  %v402_v59 = vadd.f32 %v401_v53, %v1891_v41 }
  0xe3   : > { %v403_v60 = vpop.f32.mrf.mxu0  ;;  %v564_v61 = vpop.f32.mrf.mxu1 }
  0xe4   : > { %v404_v62 = vadd.f32 %v403_v60, %v1893_v42  ;;  %v565_v63 = vadd.f32 %v564_v61, %v1895_v43  ;;  %850 = vmatprep.mubr.f32.mxu0 %v652_v55  ;;  %995 = vmatprep.mubr.f32.mxu1 %v654_v56  ;;  %v657_v0 = vmax.f32 %v563_v57, 0.0  ;;  %v655_v6 = vmax.f32 %v402_v59, 0.0 }
  0xe5   : > { %v407_v1 = vpop.f32.mrf.mxu0  ;;  %v568_v2 = vpop.f32.mrf.mxu1  ;;  %851 = vmatmul.mubr.f32.vlgmr.msra.gmra.mxu0 %v651_v58  ;;  %996 = vmatmul.mubr.f32.vlgmr.msra.gmra.mxu1 %v653_v52 }
  0xe6   : > { %v656_v3 = vmax.f32 %v404_v62, 0.0  ;;  %v658_v4 = vmax.f32 %v565_v63, 0.0  ;;  %v569_v5 = vadd.f32 %v568_v2, %v1889_v40  ;;  %v408_v7 = vadd.f32 %v407_v1, %v1891_v41 }
  0xe7   : > { %v409_v8 = vpop.f32.mrf.mxu0  ;;  %v570_v9 = vpop.f32.mrf.mxu1 }
  0xe8   : > { %v410_v10 = vadd.f32 %v409_v8, %v1893_v42  ;;  %v571_v11 = vadd.f32 %v570_v9, %v1895_v43  ;;  %855 = vmatprep.mubr.f32.mxu0 %v656_v3  ;;  %1000 = vmatprep.mubr.f32.mxu1 %v658_v4  ;;  %v661_v12 = vmax.f32 %v569_v5, 0.0  ;;  %v659_v19 = vmax.f32 %v408_v7, 0.0 }
  0xe9   : > { %v413_v13 = vpop.f32.mrf.mxu0  ;;  %v574_v14 = vpop.f32.mrf.mxu1  ;;  %856 = vmatmul.mubr.f32.gmra.mxu0 %v655_v6  ;;  %1001 = vmatmul.mubr.f32.gmra.mxu1 %v657_v0 }
  0xea   : > { %v660_v15 = vmax.f32 %v410_v10, 0.0  ;;  %v662_v16 = vmax.f32 %v571_v11, 0.0  ;;  %v575_v18 = vadd.f32 %v574_v14, %v1889_v40  ;;  %v414_v20 = vadd.f32 %v413_v13, %v1891_v41 }
  0xeb   : > { %v415_v21 = vpop.f32.mrf.mxu0  ;;  %v576_v22 = vpop.f32.mrf.mxu1 }
  0xec   : > { %v416_v23 = vadd.f32 %v415_v21, %v1893_v42  ;;  %v577_v24 = vadd.f32 %v576_v22, %v1895_v43  ;;  %860 = vmatprep.mubr.f32.mxu0 %v660_v15  ;;  %1005 = vmatprep.mubr.f32.mxu1 %v662_v16  ;;  %v665_v25 = vmax.f32 %v575_v18, 0.0  ;;  %v663_v30 = vmax.f32 %v414_v20, 0.0 }
  0xed   : > { %v419_v26 = vpop.f32.mrf.mxu0  ;;  %v580_v27 = vpop.f32.mrf.mxu1  ;;  %861 = vmatmul.mubr.f32.gmra.mxu0 %v659_v19  ;;  %1006 = vmatmul.mubr.f32.gmra.mxu1 %v661_v12 }
  0xee   : > { %v664_v28 = vmax.f32 %v416_v23, 0.0  ;;  %v666_v17 = vmax.f32 %v577_v24, 0.0  ;;  %v581_v29 = vadd.f32 %v580_v27, %v1889_v40  ;;  %v420_v31 = vadd.f32 %v419_v26, %v1891_v41 }
  0xef   : > { %v421_v32 = vpop.f32.mrf.mxu0  ;;  %v582_v33 = vpop.f32.mrf.mxu1 }
  0xf0   : > { %v422_v34 = vadd.f32 %v421_v32, %v1893_v42  ;;  %v583_v35 = vadd.f32 %v582_v33, %v1895_v43  ;;  %865 = vmatprep.mubr.f32.mxu0 %v664_v28  ;;  %1010 = vmatprep.mubr.f32.mxu1 %v666_v17  ;;  %v669_v36 = vmax.f32 %v581_v29, 0.0  ;;  %v667_v46 = vmax.f32 %v420_v31, 0.0 }
  0xf1   : > { %v425_v37 = vpop.f32.mrf.mxu0  ;;  %v586_v38 = vpop.f32.mrf.mxu1  ;;  %866 = vmatmul.mubr.f32.gmra.mxu0 %v663_v30  ;;  %1011 = vmatmul.mubr.f32.gmra.mxu1 %v665_v25 }
  0xf2   : > { %v668_v39 = vmax.f32 %v422_v34, 0.0  ;;  %v670_v44 = vmax.f32 %v583_v35, 0.0  ;;  %v587_v45 = vadd.f32 %v586_v38, %v1889_v40  ;;  %v426_v47 = vadd.f32 %v425_v37, %v1891_v41 }
  0xf3   : > { %v427_v48 = vpop.f32.mrf.mxu0  ;;  %v588_v49 = vpop.f32.mrf.mxu1 }
  0xf4   : > { %v428_v50 = vadd.f32 %v427_v48, %v1893_v42  ;;  %v589_v51 = vadd.f32 %v588_v49, %v1895_v43  ;;  %870 = vmatprep.mubr.f32.mxu0 %v668_v39  ;;  %1015 = vmatprep.mubr.f32.mxu1 %v670_v44  ;;  %v673_v52 = vmax.f32 %v587_v45, 0.0  ;;  %v671_v58 = vmax.f32 %v426_v47, 0.0 }
  0xf5   : > { %v431_v53 = vpop.f32.mrf.mxu0  ;;  %v592_v54 = vpop.f32.mrf.mxu1  ;;  %871 = vmatmul.mubr.f32.gmra.mxu0 %v667_v46  ;;  %1016 = vmatmul.mubr.f32.gmra.mxu1 %v669_v36 }
  0xf6   : > { %v672_v55 = vmax.f32 %v428_v50, 0.0  ;;  %v674_v56 = vmax.f32 %v589_v51, 0.0  ;;  %v593_v57 = vadd.f32 %v592_v54, %v1889_v40  ;;  %v432_v59 = vadd.f32 %v431_v53, %v1891_v41 }
  0xf7   : > { %v433_v60 = vpop.f32.mrf.mxu0  ;;  %v594_v61 = vpop.f32.mrf.mxu1 }
  0xf8   : > { %v434_v62 = vadd.f32 %v433_v60, %v1893_v42  ;;  %v595_v63 = vadd.f32 %v594_v61, %v1895_v43  ;;  %875 = vmatprep.mubr.f32.mxu0 %v672_v55  ;;  %1020 = vmatprep.mubr.f32.mxu1 %v674_v56  ;;  %v677_v0 = vmax.f32 %v593_v57, 0.0  ;;  %v675_v6 = vmax.f32 %v432_v59, 0.0 }
  0xf9   : > { %v437_v1 = vpop.f32.mrf.mxu0  ;;  %v598_v2 = vpop.f32.mrf.mxu1  ;;  %876 = vmatmul.mubr.f32.gmra.mxu0 %v671_v58  ;;  %1021 = vmatmul.mubr.f32.gmra.mxu1 %v673_v52 }
  0xfa   : > { %v676_v3 = vmax.f32 %v434_v62, 0.0  ;;  %v678_v4 = vmax.f32 %v595_v63, 0.0  ;;  %v599_v5 = vadd.f32 %v598_v2, %v1889_v40  ;;  %v438_v7 = vadd.f32 %v437_v1, %v1891_v41 }
  0xfb   : > { %v439_v8 = vpop.f32.mrf.mxu0  ;;  %v600_v9 = vpop.f32.mrf.mxu1 }
  0xfc   : > { %v440_v10 = vadd.f32 %v439_v8, %v1893_v42  ;;  %v601_v11 = vadd.f32 %v600_v9, %v1895_v43  ;;  %880 = vmatprep.mubr.f32.mxu0 %v676_v3  ;;  %1025 = vmatprep.mubr.f32.mxu1 %v678_v4  ;;  %v681_v12 = vmax.f32 %v599_v5, 0.0  ;;  %v679_v19 = vmax.f32 %v438_v7, 0.0 }
  0xfd   : > { %v443_v13 = vpop.f32.mrf.mxu0  ;;  %v604_v14 = vpop.f32.mrf.mxu1  ;;  %881 = vmatmul.mubr.f32.gmra.mxu0 %v675_v6  ;;  %1026 = vmatmul.mubr.f32.gmra.mxu1 %v677_v0 }
  0xfe   : > { %v680_v15 = vmax.f32 %v440_v10, 0.0  ;;  %v682_v16 = vmax.f32 %v601_v11, 0.0  ;;  %v605_v18 = vadd.f32 %v604_v14, %v1889_v40  ;;  %v444_v20 = vadd.f32 %v443_v13, %v1891_v41 }
  0xff   : > { %v445_v21 = vpop.f32.mrf.mxu0  ;;  %v606_v22 = vpop.f32.mrf.mxu1 }
 0x100   : > { %v446_v23 = vadd.f32 %v445_v21, %v1893_v42  ;;  %v607_v24 = vadd.f32 %v606_v22, %v1895_v43  ;;  %885 = vmatprep.mubr.f32.mxu0 %v680_v15  ;;  %1030 = vmatprep.mubr.f32.mxu1 %v682_v16  ;;  %v685_v25 = vmax.f32 %v605_v18, 0.0  ;;  %v683_v30 = vmax.f32 %v444_v20, 0.0 }
 0x101   : > { %v449_v26 = vpop.f32.mrf.mxu0  ;;  %v610_v27 = vpop.f32.mrf.mxu1  ;;  %886 = vmatmul.mubr.f32.gmra.mxu0 %v679_v19  ;;  %1031 = vmatmul.mubr.f32.gmra.mxu1 %v681_v12 }
 0x102   : > { %v684_v28 = vmax.f32 %v446_v23, 0.0  ;;  %v686_v17 = vmax.f32 %v607_v24, 0.0  ;;  %v611_v29 = vadd.f32 %v610_v27, %v1889_v40  ;;  %v450_v31 = vadd.f32 %v449_v26, %v1891_v41 }
 0x103   : > { %v451_v32 = vpop.f32.mrf.mxu0  ;;  %v612_v33 = vpop.f32.mrf.mxu1 }
 0x104   : > { %v452_v34 = vadd.f32 %v451_v32, %v1893_v42  ;;  %v613_v35 = vadd.f32 %v612_v33, %v1895_v43  ;;  %890 = vmatprep.mubr.f32.mxu0 %v684_v28  ;;  %1035 = vmatprep.mubr.f32.mxu1 %v686_v17  ;;  %v689_v36 = vmax.f32 %v611_v29, 0.0  ;;  %v687_v46 = vmax.f32 %v450_v31, 0.0 }
 0x105   : > { %v455_v37 = vpop.f32.mrf.mxu0  ;;  %v616_v38 = vpop.f32.mrf.mxu1  ;;  %891 = vmatmul.mubr.f32.gmra.mxu0 %v683_v30  ;;  %1036 = vmatmul.mubr.f32.gmra.mxu1 %v685_v25 }
 0x106   : > { %v688_v39 = vmax.f32 %v452_v34, 0.0  ;;  %v690_v44 = vmax.f32 %v613_v35, 0.0  ;;  %v617_v45 = vadd.f32 %v616_v38, %v1889_v40  ;;  %v456_v47 = vadd.f32 %v455_v37, %v1891_v41 }
 0x107   : > { %v457_v48 = vpop.f32.mrf.mxu0  ;;  %v618_v49 = vpop.f32.mrf.mxu1 }
 0x108   : > { %v458_v50 = vadd.f32 %v457_v48, %v1893_v42  ;;  %v619_v51 = vadd.f32 %v618_v49, %v1895_v43  ;;  %895 = vmatprep.mubr.f32.mxu0 %v688_v39  ;;  %1040 = vmatprep.mubr.f32.mxu1 %v690_v44  ;;  %v693_v52 = vmax.f32 %v617_v45, 0.0  ;;  %v691_v58 = vmax.f32 %v456_v47, 0.0 }
 0x109   : > { %v461_v53 = vpop.f32.mrf.mxu0  ;;  %v622_v54 = vpop.f32.mrf.mxu1  ;;  %896 = vmatmul.mubr.f32.gmra.mxu0 %v687_v46  ;;  %1041 = vmatmul.mubr.f32.gmra.mxu1 %v689_v36 }
 0x10a   : > { %v692_v55 = vmax.f32 %v458_v50, 0.0  ;;  %v694_v56 = vmax.f32 %v619_v51, 0.0  ;;  %v623_v57 = vadd.f32 %v622_v54, %v1889_v40  ;;  %v462_v59 = vadd.f32 %v461_v53, %v1891_v41 }
 0x10b   : > { %v463_v60 = vpop.f32.mrf.mxu0  ;;  %v624_v61 = vpop.f32.mrf.mxu1 }
 0x10c   : > { %v464_v62 = vadd.f32 %v463_v60, %v1893_v42  ;;  %v625_v63 = vadd.f32 %v624_v61, %v1895_v43  ;;  %900 = vmatprep.mubr.f32.mxu0 %v692_v55  ;;  %1045 = vmatprep.mubr.f32.mxu1 %v694_v56  ;;  %v697_v0 = vmax.f32 %v623_v57, 0.0  ;;  %v695_v6 = vmax.f32 %v462_v59, 0.0 }
 0x10d   : > { %v467_v1 = vpop.f32.mrf.mxu0  ;;  %v628_v2 = vpop.f32.mrf.mxu1  ;;  %901 = vmatmul.mubr.f32.gmra.mxu0 %v691_v58  ;;  %1046 = vmatmul.mubr.f32.gmra.mxu1 %v693_v52 }
 0x10e   : > { %v696_v3 = vmax.f32 %v464_v62, 0.0  ;;  %v698_v4 = vmax.f32 %v625_v63, 0.0  ;;  %v629_v5 = vadd.f32 %v628_v2, %v1889_v40  ;;  %v468_v7 = vadd.f32 %v467_v1, %v1891_v41 }
 0x10f   : > { %v469_v8 = vpop.f32.mrf.mxu0  ;;  %v630_v9 = vpop.f32.mrf.mxu1 }
 0x110   : > { %v470_v10 = vadd.f32 %v469_v8, %v1893_v42  ;;  %v631_v11 = vadd.f32 %v630_v9, %v1895_v43  ;;  %905 = vmatprep.mubr.f32.mxu0 %v696_v3  ;;  %1050 = vmatprep.mubr.f32.mxu1 %v698_v4  ;;  %v701_v12 = vmax.f32 %v629_v5, 0.0  ;;  %v699_v19 = vmax.f32 %v468_v7, 0.0 }
 0x111   : > { %v473_v13 = vpop.f32.mrf.mxu0  ;;  %v634_v14 = vpop.f32.mrf.mxu1  ;;  %906 = vmatmul.mubr.f32.gmra.mxu0 %v695_v6  ;;  %1051 = vmatmul.mubr.f32.gmra.mxu1 %v697_v0 }
 0x112   : > { %v700_v15 = vmax.f32 %v470_v10, 0.0  ;;  %v702_v16 = vmax.f32 %v631_v11, 0.0  ;;  %v635_v18 = vadd.f32 %v634_v14, %v1889_v40  ;;  %v474_v20 = vadd.f32 %v473_v13, %v1891_v41 }
 0x113   : > { %v475_v21 = vpop.f32.mrf.mxu0  ;;  %v636_v22 = vpop.f32.mrf.mxu1 }
 0x114   : > { %v476_v23 = vadd.f32 %v475_v21, %v1893_v42  ;;  %v637_v24 = vadd.f32 %v636_v22, %v1895_v43  ;;  %910 = vmatprep.mubr.f32.mxu0 %v700_v15  ;;  %1055 = vmatprep.mubr.f32.mxu1 %v702_v16  ;;  %v705_v25 = vmax.f32 %v635_v18, 0.0  ;;  %v703_v30 = vmax.f32 %v474_v20, 0.0 }
 0x115   : > { %v479_v26 = vpop.f32.mrf.mxu0  ;;  %v640_v27 = vpop.f32.mrf.mxu1  ;;  %911 = vmatmul.mubr.f32.gmra.mxu0 %v699_v19  ;;  %1056 = vmatmul.mubr.f32.gmra.mxu1 %v701_v12 }
 0x116   : > { %v704_v28 = vmax.f32 %v476_v23, 0.0  ;;  %v706_v17 = vmax.f32 %v637_v24, 0.0  ;;  %v641_v29 = vadd.f32 %v640_v27, %v1889_v40  ;;  %v480_v31 = vadd.f32 %v479_v26, %v1891_v41 }
 0x117   : > { %v481_v32 = vpop.f32.mrf.mxu0  ;;  %v642_v33 = vpop.f32.mrf.mxu1 }
 0x118   : > { %v482_v34 = vadd.f32 %v481_v32, %v1893_v42  ;;  %v643_v35 = vadd.f32 %v642_v33, %v1895_v43  ;;  %915 = vmatprep.mubr.f32.mxu0 %v704_v28  ;;  %1060 = vmatprep.mubr.f32.mxu1 %v706_v17  ;;  %v709_v36 = vmax.f32 %v641_v29, 0.0  ;;  %v707_v46 = vmax.f32 %v480_v31, 0.0 }
 0x119   : > { %v485_v37 = vpop.f32.mrf.mxu0  ;;  %v646_v38 = vpop.f32.mrf.mxu1  ;;  %916 = vmatmul.mubr.f32.gmra.mxu0 %v703_v30  ;;  %1061 = vmatmul.mubr.f32.gmra.mxu1 %v705_v25 }
 0x11a   : > { %v708_v39 = vmax.f32 %v482_v34, 0.0  ;;  %v710_v44 = vmax.f32 %v643_v35, 0.0  ;;  %v647_v45 = vadd.f32 %v646_v38, %v1889_v40  ;;  %v486_v47 = vadd.f32 %v485_v37, %v1891_v41 }
 0x11b   : > { %v487_v48 = vpop.f32.mrf.mxu0  ;;  %v648_v49 = vpop.f32.mrf.mxu1 }
 0x11c   : > { %v488_v50 = vadd.f32 %v487_v48, %v1893_v42  ;;  %v649_v51 = vadd.f32 %v648_v49, %v1895_v43  ;;  %920 = vmatprep.mubr.f32.mxu0 %v708_v39  ;;  %1065 = vmatprep.mubr.f32.mxu1 %v710_v44  ;;  %v713_v52 = vmax.f32 %v647_v45, 0.0  ;;  %v711_v55 = vmax.f32 %v486_v47, 0.0  ;;  %v1965_v42 = vld [vmem:[%s2058_s4] ss:$0 sm:$0xff] }
 0x11d   : > { %921 = vmatmul.mubr.f32.gmra.mxu0 %v707_v46  ;;  %1066 = vmatmul.mubr.f32.gmra.mxu1 %v709_v36 }
 0x11e   : > { %v712_v53 = vmax.f32 %v488_v50, 0.0  ;;  %v714_v54 = vmax.f32 %v649_v51, 0.0 }
 0x120   : > { %925 = vmatprep.mubr.f32.mxu0 %v712_v53  ;;  %1070 = vmatprep.mubr.f32.mxu1 %v714_v54 }
 0x121   : > { %926 = vmatmul.mubr.f32.gmra.mxu0 %v711_v55  ;;  %1071 = vmatmul.mubr.f32.gmra.mxu1 %v713_v52 }
 0x1a5   : > { %v1246_v40 = vpop.f32.mrf.mxu0  ;;  %v1326_v41 = vpop.f32.mrf.mxu1 }
 0x1a7   : > { %v1247_v43 = vpop.f32.mrf.mxu0  ;;  %v1327_v56 = vpop.f32.mrf.mxu1 }
 0x1a8   : > { %v1248_v57 = vadd.f32 %v1247_v43, %v1246_v40  ;;  %v1328_v61 = vadd.f32 %v1327_v56, %v1326_v41 }
 0x1a9   : > { %v1249_v58 = vpop.f32.mrf.mxu0  ;;  %v1329_v59 = vpop.f32.mrf.mxu1 }
 0x1aa   : > { %v853_v60 = vadd.f32 %v1248_v57, %v1965_v42 }
 0x1ab   : > { %v1250_v62 = vpop.f32.mrf.mxu0  ;;  %v1330_v63 = vpop.f32.mrf.mxu1 }
 0x1ac   : > { %v998_v0 = vadd.f32 %v1328_v61, %v853_v60  ;;  %v1251_v1 = vadd.f32 %v1250_v62, %v1249_v58  ;;  %v1331_v5 = vadd.f32 %v1330_v63, %v1329_v59 }
 0x1ad   : > { %v1252_v2 = vpop.f32.mrf.mxu0  ;;  %v1332_v3 = vpop.f32.mrf.mxu1 }
 0x1ae   : > { %1076 = vst [vmem:[%s1970_s8] sm:$0xff] %v998_v0  ;;  %v858_v4 = vadd.f32 %v1251_v1, %v1965_v42 }
 0x1af   : > { %v1253_v6 = vpop.f32.mrf.mxu0  ;;  %v1333_v7 = vpop.f32.mrf.mxu1 }
 0x1b0   : > { %v1003_v8 = vadd.f32 %v1331_v5, %v858_v4  ;;  %v1254_v9 = vadd.f32 %v1253_v6, %v1252_v2  ;;  %v1334_v13 = vadd.f32 %v1333_v7, %v1332_v3 }
 0x1b1   : > { %v1255_v10 = vpop.f32.mrf.mxu0  ;;  %v1335_v11 = vpop.f32.mrf.mxu1 }
 0x1b2   : > { %1077 = vst [vmem:[%s1970_s8 + $0x8] sm:$0xff] %v1003_v8  ;;  %v863_v12 = vadd.f32 %v1254_v9, %v1965_v42 }
 0x1b3   : > { %v1256_v14 = vpop.f32.mrf.mxu0  ;;  %v1336_v15 = vpop.f32.mrf.mxu1 }
 0x1b4   : > { %v1008_v16 = vadd.f32 %v1334_v13, %v863_v12  ;;  %v1257_v18 = vadd.f32 %v1256_v14, %v1255_v10  ;;  %v1337_v22 = vadd.f32 %v1336_v15, %v1335_v11 }
 0x1b5   : > { %v1258_v19 = vpop.f32.mrf.mxu0  ;;  %v1338_v20 = vpop.f32.mrf.mxu1 }
 0x1b6   : > { %1078 = vst [vmem:[%s1970_s8 + $0x10] sm:$0xff] %v1008_v16  ;;  %v868_v21 = vadd.f32 %v1257_v18, %v1965_v42 }
 0x1b7   : > { %v1259_v23 = vpop.f32.mrf.mxu0  ;;  %v1339_v24 = vpop.f32.mrf.mxu1 }
 0x1b8   : > { %v1013_v25 = vadd.f32 %v1337_v22, %v868_v21  ;;  %v1260_v26 = vadd.f32 %v1259_v23, %v1258_v19  ;;  %v1340_v29 = vadd.f32 %v1339_v24, %v1338_v20 }
 0x1b9   : > { %v1261_v27 = vpop.f32.mrf.mxu0  ;;  %v1341_v28 = vpop.f32.mrf.mxu1 }
 0x1ba   : > { %1079 = vst [vmem:[%s1970_s8 + $0x18] sm:$0xff] %v1013_v25  ;;  %v873_v17 = vadd.f32 %v1260_v26, %v1965_v42 }
 0x1bb   : > { %v1262_v30 = vpop.f32.mrf.mxu0  ;;  %v1342_v31 = vpop.f32.mrf.mxu1 }
 0x1bc   : > { %v1018_v32 = vadd.f32 %v1340_v29, %v873_v17  ;;  %v1263_v33 = vadd.f32 %v1262_v30, %v1261_v27  ;;  %v1343_v37 = vadd.f32 %v1342_v31, %v1341_v28 }
 0x1bd   : > { %v1264_v34 = vpop.f32.mrf.mxu0  ;;  %v1344_v35 = vpop.f32.mrf.mxu1 }
 0x1be   : > { %1080 = vst [vmem:[%s1970_s8 + $0x20] sm:$0xff] %v1018_v32  ;;  %v878_v36 = vadd.f32 %v1263_v33, %v1965_v42 }
 0x1bf   : > { %v1265_v38 = vpop.f32.mrf.mxu0  ;;  %v1345_v39 = vpop.f32.mrf.mxu1 }
 0x1c0   : > { %v1023_v44 = vadd.f32 %v1343_v37, %v878_v36  ;;  %v1266_v45 = vadd.f32 %v1265_v38, %v1264_v34  ;;  %v1346_v49 = vadd.f32 %v1345_v39, %v1344_v35 }
 0x1c1   : > { %v1267_v46 = vpop.f32.mrf.mxu0  ;;  %v1347_v47 = vpop.f32.mrf.mxu1 }
 0x1c2   : > { %1081 = vst [vmem:[%s1970_s8 + $0x28] sm:$0xff] %v1023_v44  ;;  %v883_v48 = vadd.f32 %v1266_v45, %v1965_v42 }
 0x1c3   : > { %v1268_v50 = vpop.f32.mrf.mxu0  ;;  %v1348_v51 = vpop.f32.mrf.mxu1 }
 0x1c4   : > { %v1028_v52 = vadd.f32 %v1346_v49, %v883_v48  ;;  %v1269_v53 = vadd.f32 %v1268_v50, %v1267_v46  ;;  %v1349_v41 = vadd.f32 %v1348_v51, %v1347_v47 }
 0x1c5   : > { %v1270_v54 = vpop.f32.mrf.mxu0  ;;  %v1350_v55 = vpop.f32.mrf.mxu1 }
 0x1c6   : > { %1082 = vst [vmem:[%s1970_s8 + $0x30] sm:$0xff] %v1028_v52  ;;  %v888_v40 = vadd.f32 %v1269_v53, %v1965_v42 }
 0x1c7   : > { %v1271_v43 = vpop.f32.mrf.mxu0  ;;  %v1351_v56 = vpop.f32.mrf.mxu1 }
 0x1c8   : > { %v1033_v57 = vadd.f32 %v1349_v41, %v888_v40  ;;  %v1272_v58 = vadd.f32 %v1271_v43, %v1270_v54  ;;  %v1352_v62 = vadd.f32 %v1351_v56, %v1350_v55 }
 0x1c9   : > { %v1273_v59 = vpop.f32.mrf.mxu0  ;;  %v1353_v60 = vpop.f32.mrf.mxu1 }
 0x1ca   : > { %1083 = vst [vmem:[%s1970_s8 + $0x38] sm:$0xff] %v1033_v57  ;;  %v893_v61 = vadd.f32 %v1272_v58, %v1965_v42 }
 0x1cb   : > { %v1274_v63 = vpop.f32.mrf.mxu0  ;;  %v1354_v0 = vpop.f32.mrf.mxu1 }
 0x1cc   : > { %v1038_v1 = vadd.f32 %v1352_v62, %v893_v61  ;;  %v1275_v2 = vadd.f32 %v1274_v63, %v1273_v59  ;;  %v1355_v6 = vadd.f32 %v1354_v0, %v1353_v60 }
 0x1cd   : > { %v1276_v3 = vpop.f32.mrf.mxu0  ;;  %v1356_v4 = vpop.f32.mrf.mxu1 }
 0x1ce   : > { %1084 = vst [vmem:[%s1970_s8 + $0x40] sm:$0xff] %v1038_v1  ;;  %v898_v5 = vadd.f32 %v1275_v2, %v1965_v42 }
 0x1cf   : > { %v1277_v7 = vpop.f32.mrf.mxu0  ;;  %v1357_v8 = vpop.f32.mrf.mxu1 }
 0x1d0   : > { %v1043_v9 = vadd.f32 %v1355_v6, %v898_v5  ;;  %v1278_v10 = vadd.f32 %v1277_v7, %v1276_v3  ;;  %v1358_v14 = vadd.f32 %v1357_v8, %v1356_v4 }
 0x1d1   : > { %v1279_v11 = vpop.f32.mrf.mxu0  ;;  %v1359_v12 = vpop.f32.mrf.mxu1 }
 0x1d2   : > { %1085 = vst [vmem:[%s1970_s8 + $0x48] sm:$0xff] %v1043_v9  ;;  %v903_v13 = vadd.f32 %v1278_v10, %v1965_v42 }
 0x1d3   : > { %v1280_v15 = vpop.f32.mrf.mxu0  ;;  %v1360_v16 = vpop.f32.mrf.mxu1 }
 0x1d4   : > { %v1048_v18 = vadd.f32 %v1358_v14, %v903_v13  ;;  %v1281_v19 = vadd.f32 %v1280_v15, %v1279_v11  ;;  %v1361_v23 = vadd.f32 %v1360_v16, %v1359_v12 }
 0x1d5   : > { %v1282_v20 = vpop.f32.mrf.mxu0  ;;  %v1362_v21 = vpop.f32.mrf.mxu1 }
 0x1d6   : > { %1086 = vst [vmem:[%s1970_s8 + $0x50] sm:$0xff] %v1048_v18  ;;  %v908_v22 = vadd.f32 %v1281_v19, %v1965_v42 }
 0x1d7   : > { %v1283_v24 = vpop.f32.mrf.mxu0  ;;  %v1363_v25 = vpop.f32.mrf.mxu1 }
 0x1d8   : > { %v1053_v26 = vadd.f32 %v1361_v23, %v908_v22  ;;  %v1284_v27 = vadd.f32 %v1283_v24, %v1282_v20  ;;  %v1364_v30 = vadd.f32 %v1363_v25, %v1362_v21 }
 0x1d9   : > { %v1285_v28 = vpop.f32.mrf.mxu0  ;;  %v1365_v17 = vpop.f32.mrf.mxu1 }
 0x1da   : > { %1087 = vst [vmem:[%s1970_s8 + $0x58] sm:$0xff] %v1053_v26  ;;  %v913_v29 = vadd.f32 %v1284_v27, %v1965_v42 }
 0x1db   : > { %v1286_v31 = vpop.f32.mrf.mxu0  ;;  %v1366_v32 = vpop.f32.mrf.mxu1 }
 0x1dc   : > { %v1058_v33 = vadd.f32 %v1364_v30, %v913_v29  ;;  %v1287_v34 = vadd.f32 %v1286_v31, %v1285_v28  ;;  %v1367_v38 = vadd.f32 %v1366_v32, %v1365_v17 }
 0x1dd   : > { %v1288_v35 = vpop.f32.mrf.mxu0  ;;  %v1368_v36 = vpop.f32.mrf.mxu1 }
 0x1de   : > { %1088 = vst [vmem:[%s1970_s8 + $0x60] sm:$0xff] %v1058_v33  ;;  %v918_v37 = vadd.f32 %v1287_v34, %v1965_v42 }
 0x1df   : > { %v1289_v39 = vpop.f32.mrf.mxu0  ;;  %v1369_v44 = vpop.f32.mrf.mxu1 }
 0x1e0   : > { %v1063_v45 = vadd.f32 %v1367_v38, %v918_v37  ;;  %v1290_v46 = vadd.f32 %v1289_v39, %v1288_v35  ;;  %v1370_v50 = vadd.f32 %v1369_v44, %v1368_v36 }
 0x1e1   : > { %v1291_v47 = vpop.f32.mrf.mxu0  ;;  %v1371_v48 = vpop.f32.mrf.mxu1 }
 0x1e2   : > { %1089 = vst [vmem:[%s1970_s8 + $0x68] sm:$0xff] %v1063_v45  ;;  %v923_v49 = vadd.f32 %v1290_v46, %v1965_v42 }
 0x1e3   : > { %v1292_v51 = vpop.f32.mrf.mxu0  ;;  %v1372_v52 = vpop.f32.mrf.mxu1 }
 0x1e4   : > { %v1068_v53 = vadd.f32 %v1370_v50, %v923_v49  ;;  %v1293_v54 = vadd.f32 %v1292_v51, %v1291_v47  ;;  %v1373_v40 = vadd.f32 %v1372_v52, %v1371_v48 }
 0x1e6   : > { %1090 = vst [vmem:[%s1970_s8 + $0x70] sm:$0xff] %v1068_v53  ;;  %v928_v55 = vadd.f32 %v1293_v54, %v1965_v42 }
 0x1e8   : > { %v1073_v41 = vadd.f32 %v1373_v40, %v928_v55 }
 0x1ea   : > { %1091 = vst [vmem:[%s1970_s8 + $0x78] sm:$0xff] %v1073_v41 }
 0x1eb   : > { %1429 = shalt.err (!%p1426_p3)
}
 0x1ec   : > { %s1430_s23 = scalar_lea.hbm %s2007_s13, 2048  ;;  %s1434_s30 = scalar_lea.hbm %s2059_s5, 8192 }
 0x1ed   : > { %p1431_p4 = scmp.ne.s32.totalorder %s2007_s13, %s1430_s23  ;;  %p1435_p9 = scmp.lt.s32.totalorder %s2007_s13, %s2059_s5 }
 0x1ee   : > { %p1436_p10 = scmp.lt.s32.totalorder %s1434_s30, %s1430_s23 }
 0x1ef   : > { %p1432_p7 = pnand %p1431_p4, %p1550_p5 }
 0x1f0   : > { %p1437_p11 = por %p1436_p10, %p1435_p9 }
 0x1f1   : > { %p1433_p8 = pneg %p1432_p7 }
 0x1f3   : > { %p1438_p12 = pnand %p1437_p11, %p1433_p8 }
 0x1f5   : > { %1441 = shalt.err (!%p1438_p12)
}
 0x1f6   : > { %s1480_s8 = smov 128   ;;  %s1481_s9 = smov 8  }
 0x1f7   : > { %1374 = dma.vmem_to_hbm [thread:$0]  (%p1550_p5), %s2009_s10, 2048, %s2007_s13, %s2014_s14, %s1480_s8, %s1480_s8, %s1481_s9  }
 0x1f8 PF: > { %p1380_p13 = scmp.ge.s32.totalorder %s1476_s21, 2  ;;  %s1121_s11 = sand.u32 1, %s1464_s18  }
 0x1f9   : > { %s1122_s12 = scalar_lea.sflag [#allocation3], %s1121_s11 }
 0x1fa   : > { %p1377_p0 = pnand %p1380_p13, %p1554_p6 }
 0x1fc   : > { %p1378_p1 = pneg %p1377_p0 }
 0x1fe   : > { %1459 = dma.done.wait (%p1378_p1), %s1122_s12, 2048  }
 0x1ff   : > { %1461 = vsyncadd (%p1378_p1), %s1122_s12, 4294965248  ;;  %p15_p2 = scmp.ge.s32.totalorder %s1537_s24, 6   ;;  %s2062_s18 = smov %s1468_s19 }
 0x200   : > { %s2063_s19 = smov %s1472_s20  ;;  %s2064_s20 = smov %s1548_s27 }
 0x201   : > { %s2065_s21 = smov %s1537_s24  ;;  %17 = sbr.rel (!%p15_p2) target bundleno = 3 (0x3), region = 75 }
 0x206   :  { %1127 = vsyncpa [#allocation3], 1 }
 0x207   :  { %1129 = vsyncpa [#allocation3 + $0x1], 1 }

</bundles_post_ra>
